<compile_context>
chip_gen: v7x
topology: tpu7x:2x2x1
jax: 0.10.0
libtpu: 0.0.40
codegen_flags: <defaults>
</compile_context>

<pallas_src>
import jax
import jax.numpy as jnp
from jax.experimental import pallas as pl
from jax.experimental.pallas import tpu as pltpu


def _gelu_exact(x):
    # nn.GELU() default is the exact (erf-based) GELU.
    return 0.5 * x * (1.0 + jax.lax.erf(x * 0.7071067811865476))


def domain_specific_kernel(x_ref, w1_ref, b1_ref, w2_ref, b2_ref, o_ref):
    # x_ref: (tile_r, Dp) packed tokens, lane-dense (Dp = 128 for D = 32).
    x = x_ref[...]
    # h_packed = x_packed @ W1_blockdiag -> (tile_r, Hp); MXU accumulates in f32.
    h = jnp.dot(x, w1_ref[...], preferred_element_type=jnp.float32)
    h = h + b1_ref[...]                       # (1, Hp) broadcasts over rows
    h = _gelu_exact(h)                        # f32 epilogue on the VPU/EUP
    # y_packed = gelu(h)_packed @ W2_blockdiag -> (tile_r, Dp).
    y = jnp.dot(h.astype(w2_ref.dtype), w2_ref[...],
                preferred_element_type=jnp.float32)
    y = y + b2_ref[...]                       # (1, Dp) broadcasts over rows
    o_ref[...] = y.astype(o_ref.dtype)        # lane-dense, unmasked store


def _cdiv(a, b):
    return -(-a // b)


def _round_up(a, b):
    return _cdiv(a, b) * b


def _pick_tile_r(R, target_r):
    """Packed rows per grid step.

    - One full-extent block when R is small (always BlockSpec-legal).
    - Otherwise tile_r is a multiple of 8 (sublane constraint).
    - Step count is forced EVEN so v7x's two TensorCores split the "parallel"
      axis evenly (a 3-step grid leaves one TC ~33% idle).
    """
    if R <= target_r:
        return R
    nsteps = _cdiv(R, target_r)
    if nsteps % 2:
        nsteps += 1
    tile_r = max(8, _round_up(_cdiv(R, nsteps), 8))
    return tile_r


def domain_specific(x, w1, b1, w2, b2, *, tile_tokens=16384):
    """Fused Linear(D->H) -> GELU -> Linear(H->D).

    x: [B, N, D]; w1: [D, H]; b1: [H]; w2: [H, D]; b2: [D].
    (w1/w2 are the transposed nn.Linear weights, i.e. y = x @ w + b.)
    """
    B, N, D = x.shape
    H = w1.shape[1]
    M = B * N
    dtype = x.dtype
    itemsize = jnp.dtype(dtype).itemsize

    # Lane packing factor: pack P tokens per 128-lane row when D divides 128.
    P = 128 // D if (D <= 128 and 128 % D == 0) else 1
    Dp, Hp = D * P, H * P

    # Free row-major reshape (no HBM transpose). Pad only if M % P != 0.
    xf = x.reshape(M, D)
    pad = (-M) % P
    if pad:
        xf = jnp.pad(xf, ((0, pad), (0, 0)))
    Mp = M + pad
    R = Mp // P
    xp = xf.reshape(R, Dp)

    # Tiny block-diagonal weights / tiled biases (built once, VMEM-resident).
    w1p = jnp.kron(jnp.eye(P, dtype=w1.dtype), w1)            # (Dp, Hp)
    w2p = jnp.kron(jnp.eye(P, dtype=w2.dtype), w2)            # (Hp, Dp)
    b1p = jnp.tile(b1, P).reshape(1, Hp).astype(jnp.float32)
    b2p = jnp.tile(b2, P).reshape(1, Dp).astype(jnp.float32)

    # Tile choice: big tiles amortize per-step overhead; cap so the
    # double-buffered in+out pipeline stays <= ~32 MiB of VMEM.
    max_r = max(8, (32 << 20) // (4 * Dp * itemsize))
    target_r = min(max(1, tile_tokens // P), max_r)
    tile_r = _pick_tile_r(R, target_r)
    grid = (pl.cdiv(R, tile_r),)

    compiler_kwargs = {"dimension_semantics": ("parallel",)}
    vmem_need = 4 * tile_r * Dp * itemsize + (1 << 20)   # dbl-buffered in+out + slack
    if vmem_need > (16 << 20):
        # Raise v5e's 16 MiB scoped-VMEM default for larger user-requested
        # tiles; stay well under v7x's 64 MiB physical per-TC VMEM.
        compiler_kwargs["vmem_limit_bytes"] = int(min(vmem_need, 48 << 20))

    out_p = pl.pallas_call(
        domain_specific_kernel,
        out_shape=jax.ShapeDtypeStruct((R, Dp), dtype),
        grid_spec=pltpu.PrefetchScalarGridSpec(
            num_scalar_prefetch=0,
            grid=grid,
            in_specs=[
                pl.BlockSpec((tile_r, Dp), lambda i: (i, 0)),  # packed activations
                pl.BlockSpec((Dp, Hp), lambda i: (0, 0)),      # W1 block-diag (resident)
                pl.BlockSpec((1, Hp), lambda i: (0, 0)),       # b1 tiled
                pl.BlockSpec((Hp, Dp), lambda i: (0, 0)),      # W2 block-diag (resident)
                pl.BlockSpec((1, Dp), lambda i: (0, 0)),       # b2 tiled
            ],
            out_specs=pl.BlockSpec((tile_r, Dp), lambda i: (i, 0)),
        ),
        compiler_params=pltpu.CompilerParams(**compiler_kwargs),
        cost_estimate=pl.CostEstimate(
            flops=4 * Mp * D * H,
            transcendentals=Mp * H,
            bytes_accessed=2 * Mp * D * itemsize
            + (Dp * Hp + Hp * Dp) * itemsize),
    )(xp, w1p, b1p, w2p, b2p)

    out = out_p.reshape(Mp, D)   # free row-major un-pack
    if pad:
        out = out[:M]
    return out.reshape(B, N, D)


def reference(x, w1, b1, w2, b2):
    h = jnp.dot(x, w1) + b1
    h = _gelu_exact(h)
    return jnp.dot(h, w2) + b2


if __name__ == "__main__":
    # Shapes consistent with the module: D_features=32, mlp_ratio=0.25 -> hidden=8.
    B, N, D = 2, 8, 32
    H = int(D * 0.25)

    key = jax.random.PRNGKey(0)
    kx, k1, k2, k3, k4, kx2, kx3 = jax.random.split(key, 7)

    x = jax.random.normal(kx, (B, N, D), dtype=jnp.float32)
    # Deterministic synthetic parameters (nn.Linear(D, H) / nn.Linear(H, D),
    # stored transposed so y = x @ w + b).
    w1 = jax.random.normal(k1, (D, H), dtype=jnp.float32) * 0.1
    b1 = jax.random.normal(k2, (H,), dtype=jnp.float32) * 0.1
    w2 = jax.random.normal(k3, (H, D), dtype=jnp.float32) * 0.1
    b2 = jax.random.normal(k4, (D,), dtype=jnp.float32) * 0.1

    out = domain_specific(x, w1, b1, w2, b2)
    jax.block_until_ready(out)
    ref = reference(x, w1, b1, w2, b2)
    assert out.shape == (B, N, D)
    assert jnp.allclose(out, ref, atol=2e-5, rtol=1e-5), "mismatch vs reference"

    # Multi-step grid with a ragged last tile: M=400 tokens -> 100 packed rows,
    # tile_tokens=128 -> tile_r=32 -> 4 steps (even), last block partially OOB
    # on the sublane axis. Exercises the partial-tile writeback path.
    x2 = jax.random.normal(kx2, (2, 200, D), dtype=jnp.float32)
    out2 = domain_specific(x2, w1, b1, w2, b2, tile_tokens=128)
    jax.block_until_ready(out2)
    ref2 = reference(x2, w1, b1, w2, b2)
    assert jnp.allclose(out2, ref2, atol=2e-5, rtol=1e-5), "mismatch on ragged tile"

    # Token count not divisible by the packing factor (M=7): exercises the
    # wrapper padding path.
    x3 = jax.random.normal(kx3, (1, 7, D), dtype=jnp.float32)
    out3 = domain_specific(x3, w1, b1, w2, b2)
    jax.block_until_ready(out3)
    ref3 = reference(x3, w1, b1, w2, b2)
    assert jnp.allclose(out3, ref3, atol=2e-5, rtol=1e-5), "mismatch on padded M"

    print("KERNEL_OK")
</pallas_src>

<mosaic_0001>
module attributes {stable_mosaic.version = 11 : i64} {
  func.func @domain_specific_kernel(%arg0: i32, %arg1: memref<4x128xf32, #tpu.memory_space<vmem>>, %arg2: memref<128x32xf32, #tpu.memory_space<vmem>>, %arg3: memref<1x32xf32, #tpu.memory_space<vmem>>, %arg4: memref<32x128xf32, #tpu.memory_space<vmem>>, %arg5: memref<1x128xf32, #tpu.memory_space<vmem>>, %arg6: memref<4x128xf32, #tpu.memory_space<vmem>>) attributes {dimension_semantics = [#tpu.dimension_semantics<parallel>], iteration_bounds = array<i64: 1>, scalar_prefetch = 0 : i64, scratch_operands = 0 : i64, tpu.core_type = #tpu.core_type<tc>, window_params = [{transform_indices = @transform_0, window_bounds = array<i64: 4, 128>}, {pipeline_mode = #tpu.pipeline_mode<synchronous>, transform_indices = @transform_1, window_bounds = array<i64: 128, 32>}, {pipeline_mode = #tpu.pipeline_mode<synchronous>, transform_indices = @transform_2, window_bounds = array<i64: 1, 32>}, {pipeline_mode = #tpu.pipeline_mode<synchronous>, transform_indices = @transform_3, window_bounds = array<i64: 32, 128>}, {pipeline_mode = #tpu.pipeline_mode<synchronous>, transform_indices = @transform_4, window_bounds = array<i64: 1, 128>}, {transform_indices = @transform_5, window_bounds = array<i64: 4, 128>}]} {
    %c0 = arith.constant 0 : index
    %c0_0 = arith.constant 0 : index
    %0 = vector.load %arg1[%c0, %c0_0] : memref<4x128xf32, #tpu.memory_space<vmem>>, vector<4x128xf32>
    %c0_1 = arith.constant 0 : index
    %c0_2 = arith.constant 0 : index
    %1 = vector.load %arg2[%c0_1, %c0_2] : memref<128x32xf32, #tpu.memory_space<vmem>>, vector<128x32xf32>
    %cst = arith.constant dense<0.000000e+00> : vector<4x32xf32>
    %2 = tpu.matmul %0, %1, %cst {dimension_numbers = #tpu.dot_dimension_numbers<[1], [0], [0], [1], [0, 0, 1, 1], [], []>} : vector<4x128xf32>, vector<128x32xf32>, vector<4x32xf32> -> vector<4x32xf32>
    %c0_3 = arith.constant 0 : index
    %c0_4 = arith.constant 0 : index
    %3 = vector.load %arg3[%c0_3, %c0_4] : memref<1x32xf32, #tpu.memory_space<vmem>>, vector<1x32xf32>
    %4 = vector.broadcast %3 : vector<1x32xf32> to vector<4x32xf32>
    %5 = arith.addf %2, %4 : vector<4x32xf32>
    %cst_5 = arith.constant 5.000000e-01 : f32
    %6 = vector.broadcast %cst_5 : f32 to vector<4x32xf32>
    %7 = arith.mulf %6, %5 : vector<4x32xf32>
    %cst_6 = arith.constant 0.707106769 : f32
    %8 = vector.broadcast %cst_6 : f32 to vector<4x32xf32>
    %9 = arith.mulf %5, %8 : vector<4x32xf32>
    %10 = math.erf %9 : vector<4x32xf32>
    %cst_7 = arith.constant 1.000000e+00 : f32
    %11 = vector.broadcast %cst_7 : f32 to vector<4x32xf32>
    %12 = arith.addf %11, %10 : vector<4x32xf32>
    %13 = arith.mulf %7, %12 : vector<4x32xf32>
    %c0_8 = arith.constant 0 : index
    %c0_9 = arith.constant 0 : index
    %14 = vector.load %arg4[%c0_8, %c0_9] : memref<32x128xf32, #tpu.memory_space<vmem>>, vector<32x128xf32>
    %cst_10 = arith.constant dense<0.000000e+00> : vector<4x128xf32>
    %15 = tpu.matmul %13, %14, %cst_10 {dimension_numbers = #tpu.dot_dimension_numbers<[1], [0], [0], [1], [0, 0, 1, 1], [], []>} : vector<4x32xf32>, vector<32x128xf32>, vector<4x128xf32> -> vector<4x128xf32>
    %c0_11 = arith.constant 0 : index
    %c0_12 = arith.constant 0 : index
    %16 = vector.load %arg5[%c0_11, %c0_12] : memref<1x128xf32, #tpu.memory_space<vmem>>, vector<1x128xf32>
    %17 = vector.broadcast %16 : vector<1x128xf32> to vector<4x128xf32>
    %18 = arith.addf %15, %17 : vector<4x128xf32>
    %c0_13 = arith.constant 0 : index
    %c0_14 = arith.constant 0 : index
    %19 = vector.load %arg6[%c0_13, %c0_14] : memref<4x128xf32, #tpu.memory_space<vmem>>, vector<4x128xf32>
    tpu.vector_store %arg6[%c0_13, %c0_14], %18 {strides = array<i32>} : memref<4x128xf32, #tpu.memory_space<vmem>>, vector<4x128xf32>,
    return
  }
  func.func @transform_0(%arg0: i32) -> (i32, i32) {
    %c0_i32 = arith.constant 0 : i32
    %c0_i32_0 = arith.constant 0 : i32
    return %arg0, %c0_i32 : i32, i32
  }
  func.func @transform_1(%arg0: i32) -> (i32, i32) {
    %c0_i32 = arith.constant 0 : i32
    %c0_i32_0 = arith.constant 0 : i32
    %c0_i32_1 = arith.constant 0 : i32
    return %c0_i32, %c0_i32_0 : i32, i32
  }
  func.func @transform_2(%arg0: i32) -> (i32, i32) {
    %c0_i32 = arith.constant 0 : i32
    %c0_i32_0 = arith.constant 0 : i32
    %c0_i32_1 = arith.constant 0 : i32
    return %c0_i32, %c0_i32_0 : i32, i32
  }
  func.func @transform_3(%arg0: i32) -> (i32, i32) {
    %c0_i32 = arith.constant 0 : i32
    %c0_i32_0 = arith.constant 0 : i32
    %c0_i32_1 = arith.constant 0 : i32
    return %c0_i32, %c0_i32_0 : i32, i32
  }
  func.func @transform_4(%arg0: i32) -> (i32, i32) {
    %c0_i32 = arith.constant 0 : i32
    %c0_i32_0 = arith.constant 0 : i32
    %c0_i32_1 = arith.constant 0 : i32
    return %c0_i32, %c0_i32_0 : i32, i32
  }
  func.func @transform_5(%arg0: i32) -> (i32, i32) {
    %c0_i32 = arith.constant 0 : i32
    %c0_i32_0 = arith.constant 0 : i32
    return %arg0, %c0_i32 : i32, i32
  }
}

</mosaic_0001>

<bundles_post_ra>
// kernel: tpu_custom_call.1
= control target key start
LH: loop header
LB: loop body
LE: loop exit
PB: predicated region body
PF: predicated region fallthrough
CT: control target
= control target key end

     0   :  { %v351_v3 = vmov 0.0|0.0   ;;  %vm352_vm0 = vmmov 0   ;;  %v353_v6 = vmov 0.0   ;;  %s466_s0 = inlined_call_operand.vmem [shape: f32[4,128], index: 0, kind: input, shape index: {}]   ;;  %s467_s1 = inlined_call_operand.vmem [shape: f32[128,32], index: 1, kind: input, shape index: {}]   ;;  %s468_s2 = inlined_call_operand.vmem [shape: f32[1,32], index: 2, kind: input, shape index: {}]   ;;  %s469_s3 = inlined_call_operand.vmem [shape: f32[32,128], index: 3, kind: input, shape index: {}]   ;;  %s470_s4 = inlined_call_operand.vmem [shape: f32[1,128], index: 4, kind: input, shape index: {}]   ;;  %s471_s5 = inlined_call_operand.hbm [shape: f32[4,128], index: 5, kind: output, shape index: {}]  }
   0x1   :  { %v22_v0 = vld [vmem:[%s467_s1] sm:$0xff]  ;;  %v23_v1 = vld [vmem:[%s467_s1 + $0x8] sm:$0xff]  ;;  %v24_v2 = vld [vmem:[%s467_s1 + $0x10] sm:$0xff]  ;;  %291 = vmatprep.subr.bf16.mxu0 %v351_v3  ;;  %277 = vmatprep.mubr.msk.f32.mxu0 %vm352_vm0, %v353_v6 }
   0x2   :  { %v292_v4 = vpack.c.bf16 %v23_v1, %v22_v0  ;;  %v25_v5 = vld [vmem:[%s467_s1 + $0x18] sm:$0xff]  ;;  %315 = vmatprep.subr.bf16.mxu1 %v351_v3  ;;  %288 = vmatprep.mubr.msk.f32.mxu1 %vm352_vm0, %v353_v6  ;;  %v26_v8 = vld [vmem:[%s467_s1 + $0x20] sm:$0xff]  ;;  %v27_v9 = vld [vmem:[%s467_s1 + $0x28] sm:$0xff] }
   0x3   :  { %v295_v7 = vpack.c.bf16 %v25_v5, %v24_v2 }
   0x4   :  { %293 = vmatpush3.bf16.msra.mxu0 %v292_v4 }
   0x5   :  { %294 = vmatprep.subr.bf16.mxu0 %v351_v3 }
   0x6   :  { %10 = vsyncpa [#allocation3], 0  ;;  %v298_v10 = vpack.c.bf16 %v27_v9, %v26_v8  ;;  %v28_v11 = vld [vmem:[%s467_s1 + $0x30] sm:$0xff]  ;;  %v29_v12 = vld [vmem:[%s467_s1 + $0x38] sm:$0xff]  ;;  %vm131_vm1 = vcmask 261120  }
   0x7   :  { %v301_v13 = vpack.c.bf16 %v29_v12, %v28_v11  ;;  %v30_v14 = vld [vmem:[%s467_s1 + $0x40] sm:$0xff]  ;;  %v31_v15 = vld [vmem:[%s467_s1 + $0x48] sm:$0xff]  ;;  %v32_v17 = vld [vmem:[%s467_s1 + $0x50] sm:$0xff] }
   0x8   :  { %296 = vmatpush3.bf16.msra.mxu0 %v295_v7  ;;  %v304_v16 = vpack.c.bf16 %v31_v15, %v30_v14  ;;  %v33_v18 = vld [vmem:[%s467_s1 + $0x58] sm:$0xff]  ;;  %v34_v20 = vld [vmem:[%s467_s1 + $0x60] sm:$0xff]  ;;  %v35_v21 = vld [vmem:[%s467_s1 + $0x68] sm:$0xff] }
   0x9   :  { %297 = vmatprep.subr.bf16.mxu0 %v351_v3  ;;  %v307_v19 = vpack.c.bf16 %v33_v18, %v32_v17  ;;  %v310_v22 = vpack.c.bf16 %v35_v21, %v34_v20  ;;  %v36_v23 = vld [vmem:[%s467_s1 + $0x70] sm:$0xff]  ;;  %v37_v24 = vld [vmem:[%s467_s1 + $0x78] sm:$0xff]  ;;  %v21_v26 = vld [vmem:[%s466_s0] sm:$0xf] }
   0xa   :  { %v313_v25 = vpack.c.bf16 %v37_v24, %v36_v23  ;;  %v120_v27 = vld [vmem:[%s469_s3] sm:$0xff]  ;;  %v121_v28 = vld [vmem:[%s469_s3 + $0x8] sm:$0xff]  ;;  %v122_v30 = vld [vmem:[%s469_s3 + $0x10] sm:$0xff] }
   0xb   :  { %v316_v29 = vpack.c.bf16 %v121_v28, %v120_v27  ;;  %v123_v31 = vld [vmem:[%s469_s3 + $0x18] sm:$0xff]  ;;  %v220_v33 = vld [vmem:[%s468_s2] ss:$0 sm:$0xff]  ;;  %s354_s3 = smov [#allocation2]  }
   0xc   :  { %299 = vmatpush3.bf16.msra.mxu0 %v298_v10  ;;  %v319_v32 = vpack.c.bf16 %v123_v31, %v122_v30  ;;  %v221_v42 = vld [vmem:[%s470_s4] ss:$0 sm:$0xff]  ;;  %s212_s12 = sshll.u32 %s354_s3, 4  ;;  %s213_s12 = int_to_ptr.vmem [resolvable:$true] %s212_s12 }
   0xd   :  { %300 = vmatprep.subr.bf16.mxu0 %v351_v3  ;;  %317 = vmatpush3.bf16.msra.mxu1 %v316_v29  ;;  %s327_s2 = scalar_lea.vmem %s213_s12, 64  ;;  %p332_p1 = scmp.lt.s32.totalorder %s213_s12, %s213_s12 }
   0xe   :  { %318 = vmatprep.subr.bf16.mxu1 %v351_v3  ;;  %p328_p0 = scmp.ne.s32.totalorder %s213_s12, %s327_s2  ;;  %p333_p2 = scmp.lt.s32.totalorder %s327_s2, %s327_s2 }
  0x10   :  { %302 = vmatpush3.bf16.msra.mxu0 %v301_v13  ;;  %p334_p3 = por %p333_p2, %p332_p1 }
  0x11   :  { %303 = vmatprep.subr.bf16.mxu0 %v351_v3  ;;  %320 = vmatpush3.bf16.msra.mxu1 %v319_v32 }
  0x12   :  { %p335_p4 = pnand %p334_p3, %p328_p0 }
  0x14   :  { %305 = vmatpush3.bf16.msra.mxu0 %v304_v16 }
  0x15   :  { %306 = vmatprep.subr.bf16.mxu0 %v351_v3 }
  0x18   :  { %308 = vmatpush3.bf16.msra.mxu0 %v307_v19 }
  0x19   :  { %309 = vmatprep.subr.bf16.mxu0 %v351_v3 }
  0x1c   :  { %311 = vmatpush3.bf16.msra.mxu0 %v310_v22 }
  0x1d   :  { %312 = vmatprep.subr.bf16.mxu0 %v351_v3 }
  0x20   :  { %314 = vmatpush3.bf16.msra.mxu0 %v313_v25 }
  0x23   :  { %278 = vmatmul.mubr.f32.vlgmr.msra.gmra.mrb[0].mxu0 %v21_v26 }
  0xf6   :  { %v111_v34 = vpop.f32.mrb[0].mxu0 }
  0xf7   :  { %v112_v35 = vadd.f32 %v220_v33, %v111_v34  ;;  %v279_v36 = vpop.f32.mrb[1].mxu0 }
  0xf9   :  { %v116_v37 = vmul.f32 0.70710677, %v112_v35  ;;  %v115_v39 = vmul.f32 0.5, %v112_v35 }
  0xfb   :  { %325 = verf.f32 %v116_v37 }
 0x105   :  { %v326_v38 = vpop.eup %325 }
 0x106   :  { %v118_v40 = vadd.f32 1.0, %v326_v38 }
 0x108   :  { %v119_v41 = vmul.f32 %v118_v40, %v115_v39 }
 0x10a   :  { %289 = vmatmul.mubr.msk.f32.vlgmr.msra.gmra.mrb[0].mxu1 %vm131_vm1, %v119_v41 }
 0x1dd   :  { %v201_v43 = vpop.f32.mrb[0].mxu1 }
 0x1de   :  { %v202_v44 = vadd.f32 %v221_v42, %v201_v43  ;;  %v290_v45 = vpop.f32.mrb[1].mxu1 }
 0x1e0   :  { %205 = vst [vmem:[#allocation2] sm:$0xf] %v202_v44 }
 0x1e1   :  { %338 = shalt.err (!%p335_p4)
}
 0x1e2   :  { %s339_s15 = scalar_lea.hbm %s471_s5, 64 }
 0x1e3   :  { %p340_p5 = scmp.ne.s32.totalorder %s471_s5, %s339_s15  ;;  %p343_p6 = scmp.lt.u32.totalorder %s339_s15, %s471_s5 }
 0x1e5   :  { %p345_p7 = pnand %p343_p6, %p340_p5 }
 0x1e7   :  { %348 = shalt.err (!%p345_p7)
}
 0x1e8   :  { %215 = dma.vmem_to_hbm [thread:$0]  %s213_s12, 64, %s471_s5, [#allocation3]  }
 0x1e9   :  { %349 = dma.done.wait [#allocation3], 64  }
 0x1ea   :  { %350 = vsyncadd [#allocation3], 4294967232 }
 0x1eb   :  { %219 = vsyncpa [#allocation3], 1 }

</bundles_post_ra>
